<compile_context>
chip_gen: v6e
topology: v6e:2x2x1
jax: 0.10.0
libtpu: 0.0.40
codegen_flags: <defaults>
</compile_context>

<pallas_src>
import functools

import jax
import jax.numpy as jnp
from jax.experimental import pallas as pl
from jax.experimental.pallas import tpu as pltpu

_LANES = 128
_SUBLANES = 8
_TARGET_TILE_BYTES = 1 << 20      # ~1 MiB per operand tile (0.5-2 MiB sweet spot, all gens)
_PALLAS_MIN_BATCH = 1024          # below this the fused XLA path is strictly cheaper


def _fused_scalar_other_kernel(scal_ref, x_ref, o_ref):
    # scal_ref: SMEM f32[3] = [weight, bias, other]   (one sld each)
    # x_ref / o_ref: VMEM (tile_rows, 128) blocks, lane+sublane dense.
    w = scal_ref[0]
    c = scal_ref[1] + scal_ref[2]          # bias + other (one scalar add per grid step)
    y = jnp.maximum(x_ref[...] * w + c, 0.0)   # single fused VPU op per vreg, f32 math
    o_ref[...] = y.astype(o_ref.dtype)


def _fused_rowwise_other_kernel(scal_ref, x_ref, oth_ref, o_ref):
    # scal_ref: SMEM f32[2] = [weight, bias]; oth_ref: per-row addend, same layout as x.
    w = scal_ref[0]
    b = scal_ref[1]
    y = jnp.maximum(x_ref[...] * w + b + oth_ref[...], 0.0)
    o_ref[...] = y.astype(o_ref.dtype)


def _round_up(n, m):
    return ((n + m - 1) // m) * m


def _pack_lane_sublane_dense(v_flat, rows, dtype):
    """Pad a flat length-M vector to rows*128 elements and reshape to (rows, 128)."""
    total = rows * _LANES
    pad = total - v_flat.shape[0]
    return jnp.pad(v_flat.astype(dtype), (0, pad)).reshape(rows, _LANES)


def model2_forward(x1, weight, bias, other, *, use_pallas=None):
    """Forward pass of Model2: relu(Linear(1,1)(x1) + other).

    x1:     (M, 1) input
    weight: (1, 1) Linear weight
    bias:   (1,)   Linear bias
    other:  scalar-like (size 1) or per-row ((M,1) / (M,)) addend
    """
    M, K = x1.shape
    assert K == 1 and weight.shape == (1, 1) and bias.shape == (1,)
    out_dtype = x1.dtype

    other = jnp.asarray(other)
    if other.size == 1:
        rowwise = False
    elif other.size == M and other.ndim <= 2 and (other.ndim < 2 or other.shape[1] == 1):
        rowwise = True
    else:
        # TODO(synk): broadcasts that change the output shape (e.g. (1, N) other) unsupported.
        raise ValueError(f"unsupported `other` shape {other.shape} for batch {M}")

    if use_pallas is None:
        use_pallas = M >= _PALLAS_MIN_BATCH

    w = weight.astype(jnp.float32).reshape(())
    b = bias.astype(jnp.float32).reshape(())

    if not use_pallas:
        # Tiny-shape fast path: one fused XLA elementwise (no pallas_call launch overhead).
        add = (other.astype(jnp.float32).reshape(M, 1) if rowwise
               else other.astype(jnp.float32).reshape(()))
        y = jnp.maximum(x1.astype(jnp.float32) * w + b + add, 0.0)
        return y.astype(out_dtype)

    # ---- Pallas streaming path (HBM-bandwidth bound) ----
    itemsize = jnp.dtype(out_dtype).itemsize
    tile_rows_cap = max(
        _SUBLANES,
        (_TARGET_TILE_BYTES // (_LANES * itemsize)) // _SUBLANES * _SUBLANES,
    )

    rows_raw = pl.cdiv(M, _LANES)
    if rows_raw <= tile_rows_cap:
        tile_rows = _round_up(rows_raw, _SUBLANES)
        rows = tile_rows                      # single full-array tile
    else:
        tile_rows = tile_rows_cap
        rows = _round_up(rows_raw, tile_rows)
    num_tiles = rows // tile_rows

    x_packed = _pack_lane_sublane_dense(x1.reshape(-1), rows, out_dtype)

    block = pl.BlockSpec((tile_rows, _LANES), lambda i: (i, 0))
    smem_spec = pl.BlockSpec(memory_space=pltpu.MemorySpace.SMEM)

    if rowwise:
        scalars = jnp.stack([w, b])
        oth_packed = _pack_lane_sublane_dense(other.reshape(-1), rows, out_dtype)
        kernel = _fused_rowwise_other_kernel
        in_specs = [smem_spec, block, block]
        operands = (scalars, x_packed, oth_packed)
    else:
        scalars = jnp.stack([w, b, other.astype(jnp.float32).reshape(())])
        kernel = _fused_scalar_other_kernel
        in_specs = [smem_spec, block]
        operands = (scalars, x_packed)

    out_packed = pl.pallas_call(
        kernel,
        out_shape=jax.ShapeDtypeStruct((rows, _LANES), out_dtype),
        grid_spec=pltpu.PrefetchScalarGridSpec(
            num_scalar_prefetch=0,
            grid=(num_tiles,),
            in_specs=in_specs,
            out_specs=block,
        ),
        # Output aliases the freshly-packed (hence donatable) x buffer: no separate HBM
        # output allocation for this streaming kernel. Inputs flatten as (scalars, x, ...).
        input_output_aliases={1: 0},
        compiler_params=pltpu.CompilerParams(
            dimension_semantics=("parallel",),   # lets v7x shard the grid over its 2 TCs
        ),
    )(*operands)

    return out_packed.reshape(-1)[:M].reshape(M, 1)


if __name__ == "__main__":
    key = jax.random.PRNGKey(0)
    k_x, k_o, k_w, k_b, k_x2, k_o2, k_x3 = jax.random.split(key, 7)

    # PyTorch default init for Linear(1, 1): U(-1/sqrt(in), 1/sqrt(in)) with in = 1.
    weight = jax.random.uniform(k_w, (1, 1), jnp.float32, minval=-1.0, maxval=1.0)
    bias = jax.random.uniform(k_b, (1,), jnp.float32, minval=-1.0, maxval=1.0)

    def ref_fwd(x, oth):
        y = (x.astype(jnp.float32) * weight.astype(jnp.float32).reshape(())
             + bias.astype(jnp.float32) + oth.astype(jnp.float32))
        return jnp.maximum(y, 0.0).astype(x.dtype)

    # 1) Literal spec shape (1, 1): auto-dispatch takes the fused XLA fast path.
    x1 = jax.random.normal(k_x, (1, 1), dtype=jnp.float32)
    other = jax.random.normal(k_o, (1, 1), dtype=jnp.float32)
    out = jax.block_until_ready(model2_forward(x1, weight, bias, other))
    assert out.shape == (1, 1)
    assert jnp.allclose(out, ref_fwd(x1, other), atol=1e-6), (out, ref_fwd(x1, other))

    # 2) Batched f32 + scalar `other`: forced Pallas grid path (lane+sublane dense tiles).
    fwd_pallas = jax.jit(functools.partial(model2_forward, use_pallas=True))
    xb = jax.random.normal(k_x2, (2048, 1), dtype=jnp.float32)
    out_b = jax.block_until_ready(fwd_pallas(xb, weight, bias, other))
    assert out_b.shape == (2048, 1)
    assert jnp.allclose(out_b, ref_fwd(xb, other), atol=1e-5), "batched f32 mismatch"

    # 3) Batched bf16 + per-row `other`: exercises padding/crop, rowwise broadcast, dtype follow.
    xc = jax.random.normal(k_x3, (300, 1), dtype=jnp.float32).astype(jnp.bfloat16)
    oc = jax.random.normal(k_o2, (300, 1), dtype=jnp.float32).astype(jnp.bfloat16)
    out_c = jax.block_until_ready(fwd_pallas(xc, weight, bias, oc))
    assert out_c.shape == (300, 1) and out_c.dtype == jnp.bfloat16
    assert jnp.allclose(out_c.astype(jnp.float32),
                        ref_fwd(xc, oc).astype(jnp.float32),
                        atol=2e-2, rtol=2e-2), "batched bf16 mismatch"

    print("KERNEL_OK")
</pallas_src>

<mosaic_0001>
module attributes {stable_mosaic.version = 11 : i64} {
  func.func @_fused_scalar_other_kernel(%arg0: i32, %arg1: memref<3xf32, #tpu.memory_space<smem>>, %arg2: memref<16x128xf32, #tpu.memory_space<vmem>>, %arg3: memref<16x128xf32, #tpu.memory_space<vmem>>) attributes {dimension_semantics = [#tpu.dimension_semantics<parallel>], iteration_bounds = array<i64: 1>, scalar_prefetch = 0 : i64, scratch_operands = 0 : i64, tpu.core_type = #tpu.core_type<tc>, window_params = [{transform_indices = @transform_0, window_bounds = array<i64: 3>}, {transform_indices = @transform_1, window_bounds = array<i64: 16, 128>}, {transform_indices = @transform_2, window_bounds = array<i64: 16, 128>}]} {
    %c0 = arith.constant 0 : index
    %0 = memref.load %arg1[%c0] : memref<3xf32, #tpu.memory_space<smem>>
    %c1 = arith.constant 1 : index
    %1 = memref.load %arg1[%c1] : memref<3xf32, #tpu.memory_space<smem>>
    %c2 = arith.constant 2 : index
    %2 = memref.load %arg1[%c2] : memref<3xf32, #tpu.memory_space<smem>>
    %3 = arith.addf %1, %2 : f32
    %c0_0 = arith.constant 0 : index
    %c0_1 = arith.constant 0 : index
    %4 = vector.load %arg2[%c0_0, %c0_1] : memref<16x128xf32, #tpu.memory_space<vmem>>, vector<16x128xf32>
    %5 = vector.broadcast %0 : f32 to vector<16x128xf32>
    %6 = arith.mulf %4, %5 : vector<16x128xf32>
    %7 = vector.broadcast %3 : f32 to vector<16x128xf32>
    %8 = arith.addf %6, %7 : vector<16x128xf32>
    %cst = arith.constant 0.000000e+00 : f32
    %9 = vector.broadcast %cst : f32 to vector<16x128xf32>
    %10 = arith.maximumf %8, %9 : vector<16x128xf32>
    %c0_2 = arith.constant 0 : index
    %c0_3 = arith.constant 0 : index
    %11 = vector.load %arg3[%c0_2, %c0_3] : memref<16x128xf32, #tpu.memory_space<vmem>>, vector<16x128xf32>
    tpu.vector_store %arg3[%c0_2, %c0_3], %10 {strides = array<i32>} : memref<16x128xf32, #tpu.memory_space<vmem>>, vector<16x128xf32>,
    return
  }
  func.func @transform_0(%arg0: i32) -> i32 {
    %c0_i32 = arith.constant 0 : i32
    %c0_i32_0 = arith.constant 0 : i32
    return %c0_i32 : i32
  }
  func.func @transform_1(%arg0: i32) -> (i32, i32) {
    %c0_i32 = arith.constant 0 : i32
    %c0_i32_0 = arith.constant 0 : i32
    return %arg0, %c0_i32 : i32, i32
  }
  func.func @transform_2(%arg0: i32) -> (i32, i32) {
    %c0_i32 = arith.constant 0 : i32
    %c0_i32_0 = arith.constant 0 : i32
    return %arg0, %c0_i32 : i32, i32
  }
}

</mosaic_0001>

<bundles_post_ra>
// kernel: model2_forward.1
= control target key start
LH: loop header
LB: loop body
LE: loop exit
PB: predicated region body
PF: predicated region fallthrough
CT: control target
= control target key end

     0   :  { %7 = vsyncpa [#allocation3], 0  ;;  %s93_s0 = inlined_call_operand.vmem [shape: f32[3], index: 0, kind: input, shape index: {}]   ;;  %s94_s1 = inlined_call_operand.vmem [shape: f32[16,128], index: 1, kind: input, shape index: {}, may-alias: {1,2}]   ;;  %s95_s2 = inlined_call_operand.vmem [shape: f32[16,128], index: 2, kind: output, shape index: {}, may-alias: {1,2}]  }
   0x1   :  { %s14_s11 = sshll.u32 %s93_s0, 4  ;;  %s15_s11 = int_to_ptr.vmem [resolvable:$true] %s14_s11 }
   0x2   :  { %s48_s12 = scalar_lea.vmem %s15_s11, 16  ;;  %p53_p1 = scmp.lt.s32.totalorder %s15_s11, %s15_s11 }
   0x3   :  { %p49_p0 = scmp.ne.s32.totalorder %s15_s11, %s48_s12  ;;  %p54_p2 = scmp.lt.s32.totalorder %s48_s12, %s48_s12 }
   0x5   :  { %p55_p3 = por %p54_p2, %p53_p1 }
   0x7   :  { %p56_p4 = pnand %p55_p3, %p49_p0 }
   0x9   :  { %59 = shalt.err (!%p56_p4)
}
   0xa   :  { %s62_s13 = smov [#allocation2]  }
   0xb   :  { %17 = dma.vmem_to_smem %s15_s11, 16, %s62_s13, [#allocation3]  }
   0xc   :  { %60 = dma.done.wait [#allocation3], 16  }
   0xd   :  { %61 = vsyncadd [#allocation3], 4294967280 }
   0xe   :  { %23 = sfence }
   0xf   :  { %s24_s14 = sld [smem:[#allocation2]]  ;;  %v28_v0 = vld [vmem:[%s94_s1] sm:$0xff]  ;;  %v29_v1 = vld [vmem:[%s94_s1 + $0x8] sm:$0xff] }
  0x10   :  { %s45_s15 = sld [smem:[#allocation2 + $0x1]] }
  0x11   :  { %s46_s16 = sld [smem:[#allocation2 + $0x2]] }
  0x15   :  { %v30_v2 = vstv %s24_s14 }
  0x16   :  { %v31_v3 = vmul.f32 %v30_v2, %v28_v0  ;;  %v32_v4 = vmul.f32 %v30_v2, %v29_v1 }
  0x17   :  { %s27_s20 = sadd.f32 %s46_s16, %s45_s15 }
  0x19   :  { %v33_v5 = vstv %s27_s20 }
  0x1a   :  { %v34_v6 = vadd.f32 %v33_v5, %v31_v3  ;;  %v35_v7 = vadd.f32 %v33_v5, %v32_v4 }
  0x1c   :  { %v36_v8 = vmax.f32 %v34_v6, 0.0  ;;  %v37_v9 = vmax.f32 %v35_v7, 0.0 }
  0x1e   :  { %38 = vst [vmem:[%s95_s2] sm:$0xff] %v36_v8  ;;  %39 = vst [vmem:[%s95_s2 + $0x8] sm:$0xff] %v37_v9 }
  0x1f   :  { %44 = vsyncpa [#allocation3], 1 }

</bundles_post_ra>
